<compile_context>
chip_gen: v7x
topology: tpu7x:2x2x1
jax: 0.10.0
libtpu: 0.0.40
codegen_flags: <defaults>
</compile_context>

<pallas_src>
import functools

import jax
import jax.numpy as jnp
from jax.experimental import pallas as pl
from jax.experimental.pallas import tpu as pltpu

EPS = 1e-6
_VMEM_LIMIT_BYTES = 48 * 1024 * 1024     # safe on v5e/v6e (128 MiB) and v7x (64 MiB)
_VMEM_TILE_BUDGET = 24 * 1024 * 1024     # double-buffered working-set budget


def _rows_tiling(rows, width, itemsize, n_streams, max_tile=1024,
                 vmem_budget=_VMEM_TILE_BUDGET):
    """Pick a row tile that fits the VMEM budget (double-buffered streams)."""
    per_row = 2 * n_streams * width * itemsize
    fit = max(8, vmem_budget // max(per_row, 1))
    tile = int(min(max_tile, fit))
    tile = max(8, (tile // 8) * 8)
    if rows <= tile:
        # single block covering the whole array (block == full dims is always legal)
        return rows, 1, 0
    padded = ((rows + tile - 1) // tile) * tile
    return tile, padded // tile, padded - rows


# ----------------------------------------------------------------------------
# LayerNorm kernel  (custom: uses UNBIASED std, like torch.Tensor.std default)
# ----------------------------------------------------------------------------
def _layer_norm_kernel(alpha_ref, beta_ref, x_ref, o_ref, *, eps):
    x = x_ref[...].astype(jnp.float32)                       # (tile_rows, d_model)
    d = x.shape[-1]
    # single pass over x: sum and sum-of-squares
    s1 = jnp.sum(x, axis=-1, keepdims=True)
    s2 = jnp.sum(x * x, axis=-1, keepdims=True)
    mean = s1 * (1.0 / d)
    denom = float(max(d - 1, 1))                              # Bessel-corrected (N-1)
    var = jnp.maximum(s2 - mean * s1, 0.0) / denom
    std = jnp.sqrt(var)
    inv = 1.0 / (std + eps)                                   # per-row only, cheap
    diff = x - mean
    alpha = alpha_ref[...].astype(jnp.float32)
    beta = beta_ref[...].astype(jnp.float32)
    o_ref[...] = (diff * inv * alpha + beta).astype(o_ref.dtype)


def layer_norm(x, alpha, beta, *, eps=EPS):
    orig_shape = x.shape
    d_model = orig_shape[-1]
    x2 = x.reshape(-1, d_model)
    rows = x2.shape[0]
    tile_rows, grid, pad = _rows_tiling(rows, d_model, x2.dtype.itemsize, n_streams=2)
    if pad:
        x2 = jnp.pad(x2, ((0, pad), (0, 0)))
    alpha2 = alpha.reshape(1, d_model)
    beta2 = beta.reshape(1, d_model)

    out = pl.pallas_call(
        functools.partial(_layer_norm_kernel, eps=eps),
        out_shape=jax.ShapeDtypeStruct((rows + pad, d_model), x.dtype),
        grid_spec=pltpu.PrefetchScalarGridSpec(
            num_scalar_prefetch=0,
            grid=(grid,),
            in_specs=[
                pl.BlockSpec((1, d_model), lambda i: (0, 0)),           # alpha
                pl.BlockSpec((1, d_model), lambda i: (0, 0)),           # beta
                pl.BlockSpec((tile_rows, d_model), lambda i: (i, 0)),   # x
            ],
            out_specs=pl.BlockSpec((tile_rows, d_model), lambda i: (i, 0)),
        ),
        compiler_params=pltpu.CompilerParams(
            dimension_semantics=("parallel",),
            vmem_limit_bytes=_VMEM_LIMIT_BYTES,
        ),
    )(alpha2, beta2, x2)
    if pad:
        out = out[:rows]
    return out.reshape(orig_shape)


# ----------------------------------------------------------------------------
# Residual add + dropout kernel
# ----------------------------------------------------------------------------
def _residual_dropout_add_kernel(seed_ref, x_ref, sub_ref, o_ref, *, p, tile_rows, width):
    x = x_ref[...]
    s = sub_ref[...]
    if p > 0.0:
        # TODO(synk): cannot reproduce torch.nn.Dropout's exact RNG stream; uses a
        # portable stateless integer hash with identical (keep-prob, 1/(1-p)) semantics.
        seed = seed_ref[0].astype(jnp.uint32)
        row0 = (pl.program_id(0) * tile_rows).astype(jnp.uint32)
        rows_iota = jax.lax.broadcasted_iota(jnp.int32, s.shape, 0).astype(jnp.uint32)
        cols_iota = jax.lax.broadcasted_iota(jnp.int32, s.shape, 1).astype(jnp.uint32)
        flat = (row0 + rows_iota) * jnp.uint32(width) + cols_iota
        # lowbias32 integer mixer
        h = flat ^ seed
        h = (h ^ (h >> 16)) * jnp.uint32(0x7FEB352D)
        h = (h ^ (h >> 15)) * jnp.uint32(0x846CA68B)
        h = h ^ (h >> 16)
        threshold = jnp.uint32(min(int(p * 4294967296.0), 4294967295))
        keep = h >= threshold                                  # P(keep) = 1 - p
        scale = jnp.asarray(1.0 / (1.0 - p), dtype=s.dtype)
        s = jnp.where(keep, s * scale, jnp.zeros_like(s))
    o_ref[...] = (x + s).astype(o_ref.dtype)                   # add in input dtype


def residual_dropout_add(x, sub_out, *, p, seed):
    orig_shape = x.shape
    total = x.size
    d_last = orig_shape[-1]
    # lane-dense layout for this pure elementwise op (last dim multiple of 128 if possible)
    if total % 512 == 0:
        width = 512
    elif total % 128 == 0:
        width = 128
    else:
        width = d_last
    x2 = x.reshape(-1, width)
    s2 = sub_out.reshape(-1, width)
    rows = x2.shape[0]
    tile_rows, grid, pad = _rows_tiling(rows, width, x2.dtype.itemsize, n_streams=3)
    if pad:
        x2 = jnp.pad(x2, ((0, pad), (0, 0)))
        s2 = jnp.pad(s2, ((0, pad), (0, 0)))
    seed_arr = jnp.asarray([seed], dtype=jnp.int32)

    out = pl.pallas_call(
        functools.partial(_residual_dropout_add_kernel, p=float(p),
                          tile_rows=tile_rows, width=width),
        out_shape=jax.ShapeDtypeStruct((rows + pad, width), x.dtype),
        grid_spec=pltpu.PrefetchScalarGridSpec(
            num_scalar_prefetch=1,                               # seed lands in SMEM
            grid=(grid,),
            in_specs=[
                pl.BlockSpec((tile_rows, width), lambda i, seed: (i, 0)),   # x
                pl.BlockSpec((tile_rows, width), lambda i, seed: (i, 0)),   # sublayer out
            ],
            out_specs=pl.BlockSpec((tile_rows, width), lambda i, seed: (i, 0)),
        ),
        compiler_params=pltpu.CompilerParams(
            dimension_semantics=("parallel",),                  # independent rows; 2 TCs on v7x
            vmem_limit_bytes=_VMEM_LIMIT_BYTES,
        ),
    )(seed_arr, x2, s2)
    if pad:
        out = out[:rows]
    return out.reshape(orig_shape)


# ----------------------------------------------------------------------------
# ResidualConnection forward:  x + Dropout(sublayer(LayerNorm(x)))
# ----------------------------------------------------------------------------
def residual_connection(x, sublayer, alpha, beta, *, res_dropout, seed=0):
    ln = layer_norm(x, alpha, beta, eps=EPS)
    sub_out = sublayer(ln)          # sublayer is an arbitrary user callable (plain JAX glue)
    return residual_dropout_add(x, sub_out, p=res_dropout, seed=seed)


if __name__ == "__main__":
    key = jax.random.PRNGKey(0)
    kx, kw = jax.random.split(key)

    batch, seq, d_model = 2, 8, 32
    x = jax.random.normal(kx, (batch, seq, d_model), dtype=jnp.float32)

    # LayerNorm parameters (as in __init__: alpha=ones, beta=zeros)
    alpha = jnp.ones((d_model,), dtype=jnp.float32)
    beta = jnp.zeros((d_model,), dtype=jnp.float32)

    # Deterministic example sublayer: simple linear map (plain JAX glue)
    W = jax.random.normal(kw, (d_model, d_model), dtype=jnp.float32) * 0.02
    sublayer = lambda h: h @ W

    # --- correctness check with dropout disabled (eval-mode semantics) ---
    out = residual_connection(x, sublayer, alpha, beta, res_dropout=0.0)
    out = jax.block_until_ready(out)

    def ref_layer_norm(xx):
        mean = xx.mean(axis=-1, keepdims=True)
        std = jnp.sqrt(((xx - mean) ** 2).sum(axis=-1, keepdims=True) / (d_model - 1))
        return alpha * (xx - mean) / (std + EPS) + beta

    ref = x + sublayer(ref_layer_norm(x))
    assert jnp.allclose(out, ref, atol=1e-5, rtol=1e-5), "mismatch vs reference"

    # --- run once with dropout active (training-mode semantics) ---
    out_drop = residual_connection(x, sublayer, alpha, beta, res_dropout=0.1, seed=123)
    jax.block_until_ready(out_drop)
    assert out_drop.shape == x.shape and bool(jnp.all(jnp.isfinite(out_drop)))

    print("KERNEL_OK")
</pallas_src>

<mosaic_0001>
module attributes {stable_mosaic.version = 11 : i64} {
  func.func @_layer_norm_kernel(%arg0: i32, %arg1: memref<1x32xf32, #tpu.memory_space<vmem>>, %arg2: memref<1x32xf32, #tpu.memory_space<vmem>>, %arg3: memref<16x32xf32, #tpu.memory_space<vmem>>, %arg4: memref<16x32xf32, #tpu.memory_space<vmem>>) attributes {dimension_semantics = [#tpu.dimension_semantics<parallel>], iteration_bounds = array<i64: 1>, scalar_prefetch = 0 : i64, scratch_operands = 0 : i64, tpu.core_type = #tpu.core_type<tc>, window_params = [{pipeline_mode = #tpu.pipeline_mode<synchronous>, transform_indices = @transform_0, window_bounds = array<i64: 1, 32>}, {pipeline_mode = #tpu.pipeline_mode<synchronous>, transform_indices = @transform_1, window_bounds = array<i64: 1, 32>}, {transform_indices = @transform_2, window_bounds = array<i64: 16, 32>}, {transform_indices = @transform_3, window_bounds = array<i64: 16, 32>}]} {
    %c0 = arith.constant 0 : index
    %c0_0 = arith.constant 0 : index
    %0 = vector.load %arg3[%c0, %c0_0] : memref<16x32xf32, #tpu.memory_space<vmem>>, vector<16x32xf32>
    %cst = arith.constant dense<0.000000e+00> : vector<16xf32>
    %1 = vector.multi_reduction <add>, %0, %cst [1] : vector<16x32xf32> to vector<16xf32>
    %2 = vector.shape_cast %1 : vector<16xf32> to vector<16x1xf32>
    %3 = arith.mulf %0, %0 : vector<16x32xf32>
    %cst_1 = arith.constant dense<0.000000e+00> : vector<16xf32>
    %4 = vector.multi_reduction <add>, %3, %cst_1 [1] : vector<16x32xf32> to vector<16xf32>
    %5 = vector.shape_cast %4 : vector<16xf32> to vector<16x1xf32>
    %cst_2 = arith.constant 3.125000e-02 : f32
    %6 = vector.broadcast %cst_2 : f32 to vector<16x1xf32>
    %7 = arith.mulf %2, %6 : vector<16x1xf32>
    %8 = arith.mulf %7, %2 : vector<16x1xf32>
    %9 = arith.subf %5, %8 : vector<16x1xf32>
    %cst_3 = arith.constant 0.000000e+00 : f32
    %10 = vector.broadcast %cst_3 : f32 to vector<16x1xf32>
    %11 = arith.maximumf %9, %10 : vector<16x1xf32>
    %cst_4 = arith.constant 3.100000e+01 : f32
    %12 = vector.broadcast %cst_4 : f32 to vector<16x1xf32>
    %13 = arith.divf %11, %12 : vector<16x1xf32>
    %14 = math.sqrt %13 : vector<16x1xf32>
    %cst_5 = arith.constant 9.99999997E-7 : f32
    %15 = vector.broadcast %cst_5 : f32 to vector<16x1xf32>
    %16 = arith.addf %14, %15 : vector<16x1xf32>
    %cst_6 = arith.constant 1.000000e+00 : f32
    %17 = vector.broadcast %cst_6 : f32 to vector<16x1xf32>
    %18 = arith.divf %17, %16 : vector<16x1xf32>
    %19 = vector.broadcast %7 : vector<16x1xf32> to vector<16x32xf32>
    %20 = arith.subf %0, %19 : vector<16x32xf32>
    %c0_7 = arith.constant 0 : index
    %c0_8 = arith.constant 0 : index
    %21 = vector.load %arg1[%c0_7, %c0_8] : memref<1x32xf32, #tpu.memory_space<vmem>>, vector<1x32xf32>
    %c0_9 = arith.constant 0 : index
    %c0_10 = arith.constant 0 : index
    %22 = vector.load %arg2[%c0_9, %c0_10] : memref<1x32xf32, #tpu.memory_space<vmem>>, vector<1x32xf32>
    %23 = vector.broadcast %18 : vector<16x1xf32> to vector<16x32xf32>
    %24 = arith.mulf %20, %23 : vector<16x32xf32>
    %25 = vector.broadcast %21 : vector<1x32xf32> to vector<16x32xf32>
    %26 = arith.mulf %24, %25 : vector<16x32xf32>
    %27 = vector.broadcast %22 : vector<1x32xf32> to vector<16x32xf32>
    %28 = arith.addf %26, %27 : vector<16x32xf32>
    %c0_11 = arith.constant 0 : index
    %c0_12 = arith.constant 0 : index
    %29 = vector.load %arg4[%c0_11, %c0_12] : memref<16x32xf32, #tpu.memory_space<vmem>>, vector<16x32xf32>
    tpu.vector_store %arg4[%c0_11, %c0_12], %28 {strides = array<i32>} : memref<16x32xf32, #tpu.memory_space<vmem>>, vector<16x32xf32>,
    return
  }
  func.func @transform_0(%arg0: i32) -> (i32, i32) {
    %c0_i32 = arith.constant 0 : i32
    %c0_i32_0 = arith.constant 0 : i32
    %c0_i32_1 = arith.constant 0 : i32
    return %c0_i32, %c0_i32_0 : i32, i32
  }
  func.func @transform_1(%arg0: i32) -> (i32, i32) {
    %c0_i32 = arith.constant 0 : i32
    %c0_i32_0 = arith.constant 0 : i32
    %c0_i32_1 = arith.constant 0 : i32
    return %c0_i32, %c0_i32_0 : i32, i32
  }
  func.func @transform_2(%arg0: i32) -> (i32, i32) {
    %c0_i32 = arith.constant 0 : i32
    %c0_i32_0 = arith.constant 0 : i32
    return %arg0, %c0_i32 : i32, i32
  }
  func.func @transform_3(%arg0: i32) -> (i32, i32) {
    %c0_i32 = arith.constant 0 : i32
    %c0_i32_0 = arith.constant 0 : i32
    return %arg0, %c0_i32 : i32, i32
  }
}

</mosaic_0001>

<bundles_post_ra>
// kernel: tpu_custom_call.1
= control target key start
LH: loop header
LB: loop body
LE: loop exit
PB: predicated region body
PF: predicated region fallthrough
CT: control target
= control target key end

     0   :  { %8 = vsyncpa [#allocation3], 0  ;;  %s301_s0 = inlined_call_operand.hbm [shape: f32[1,32], index: 0, kind: input, shape index: {}]   ;;  %s302_s1 = inlined_call_operand.vmem [shape: f32[1,32], index: 1, kind: input, shape index: {}]   ;;  %s303_s2 = inlined_call_operand.hbm [shape: f32[16,32], index: 2, kind: input, shape index: {}]   ;;  %s304_s3 = inlined_call_operand.hbm [shape: f32[16,32], index: 3, kind: output, shape index: {}]  }
   0x1   :  { %9 = vsyncpa [#allocation6], 0 }
   0x2   :  { %10 = vsyncpa [#allocation4], 0  ;;  %s218_s12 = smov [#allocation2]   ;;  %s219_s14 = smov [#allocation5]  }
   0x3   :  { %s17_s13 = sshll.u32 %s218_s12, 4  ;;  %s28_s15 = sshll.u32 %s219_s14, 4  ;;  %s18_s13 = int_to_ptr.vmem [resolvable:$true] %s17_s13  ;;  %s243_s15 = int_to_ptr.vmem [resolvable:$true] %s28_s15 }
   0x4   :  { %s146_s18 = scalar_lea.hbm %s301_s0, 16 }
   0x5   :  { %p147_p0 = scmp.ne.s32.totalorder %s301_s0, %s146_s18  ;;  %p150_p1 = scmp.lt.u32.totalorder %s146_s18, %s301_s0 }
   0x7   :  { %p152_p2 = pnand %p150_p1, %p147_p0 }
   0x9   :  { %155 = shalt.err (!%p152_p2)
}
   0xa   :  { %s156_s23 = scalar_lea.vmem %s18_s13, 16  ;;  %s160_s24 = scalar_lea.vmem %s18_s13, 32 }
   0xb   :  { %p157_p3 = scmp.ne.s32.totalorder %s18_s13, %s156_s23  ;;  %p161_p4 = scmp.lt.s32.totalorder %s18_s13, %s18_s13 }
   0xc   :  { %p162_p5 = scmp.lt.s32.totalorder %s160_s24, %s156_s23 }
   0xe   :  { %p163_p6 = por %p162_p5, %p161_p4 }
  0x10   :  { %p164_p7 = pnand %p163_p6, %p157_p3 }
  0x12   :  { %167 = shalt.err (!%p164_p7)
}
  0x13   :  { %20 = dma.hbm_to_vmem [thread:$0]  %s301_s0, 16, %s18_s13, [#allocation3]  }
  0x14   :  { %s168_s29 = scalar_lea.hbm %s303_s2, 256 }
  0x15   :  { %p169_p8 = scmp.ne.s32.totalorder %s303_s2, %s168_s29  ;;  %p172_p9 = scmp.lt.u32.totalorder %s168_s29, %s303_s2 }
  0x17   :  { %p174_p10 = pnand %p172_p9, %p169_p8 }
  0x19   :  { %177 = shalt.err (!%p174_p10)
}
  0x1a   :  { %s178_s7 = scalar_lea.vmem %s243_s15, 256  ;;  %p183_p12 = scmp.lt.s32.totalorder %s243_s15, %s243_s15 }
  0x1b   :  { %p179_p11 = scmp.ne.s32.totalorder %s243_s15, %s178_s7  ;;  %p184_p13 = scmp.lt.s32.totalorder %s178_s7, %s178_s7 }
  0x1d   :  { %p185_p0 = por %p184_p13, %p183_p12 }
  0x1f   :  { %p186_p1 = pnand %p185_p0, %p179_p11 }
  0x21   :  { %189 = shalt.err (!%p186_p1)
}
  0x22   :  { %s220_s0 = smov 128   ;;  %s221_s8 = smov 8  }
  0x23   :  { %34 = dma.hbm_to_vmem [thread:$0]  %s303_s2, 256, %s243_s15, [#allocation6], %s220_s0, %s220_s0, %s221_s8  }
  0x24   :  { %212 = dma.done.wait [#allocation3], 16  }
  0x25   :  { %213 = vsyncadd [#allocation3], 4294967280 }
  0x26   :  { %214 = dma.done.wait [#allocation6], 256  }
  0x27   :  { %215 = vsyncadd [#allocation6], 4294967040  ;;  %vm43_vm0 = vcmask 261120   ;;  %v41_v0 = vld [vmem:[#allocation5] sm:$0xff]  ;;  %v42_v1 = vld [vmem:[#allocation5 + $0x8] sm:$0xff]  ;;  %s222_s12 = smov [#allocation7]  }
  0x28   :  { %v44_v2 = vsel %vm43_vm0, %v41_v0, 0.0  ;;  %v50_v3 = vmul.f32 %v41_v0, %v41_v0  ;;  %v51_v4 = vmul.f32 %v42_v1, %v42_v1  ;;  %v47_v6 = vsel %vm43_vm0, %v42_v1, 0.0  ;;  %v131_v36 = vld [vmem:[#allocation2] ss:$0 sm:$0xff]  ;;  %s118_s13 = sshll.u32 %s222_s12, 4  ;;  %s119_s13 = int_to_ptr.vmem [resolvable:$true] %s118_s13 }
  0x29   :  { %45 = vadd.xlane.f32.xlu0 %v44_v2  ;;  %v132_v38 = vld [vmem:[%s302_s1] ss:$0 sm:$0xff]  ;;  %s190_s14 = scalar_lea.vmem %s119_s13, 256  ;;  %p195_p3 = scmp.lt.s32.totalorder %s119_s13, %s119_s13 }
  0x2a   :  { %v52_v5 = vsel %vm43_vm0, %v50_v3, 0.0  ;;  %v55_v7 = vsel %vm43_vm0, %v51_v4, 0.0  ;;  %p191_p2 = scmp.ne.s32.totalorder %s119_s13, %s190_s14  ;;  %p196_p4 = scmp.lt.s32.totalorder %s190_s14, %s190_s14 }
  0x2b   :  { %53 = vadd.xlane.f32.xlu1 %v52_v5 }
  0x2c   :  { %p197_p5 = por %p196_p4, %p195_p3 }
  0x2d   :  { %48 = vadd.xlane.f32.xlu0 %v47_v6 }
  0x2e   :  { %p198_p6 = pnand %p197_p5, %p191_p2 }
  0x2f   :  { %56 = vadd.xlane.f32.xlu1 %v55_v7 }
  0xb6   :  { %v46_v8 = vpop.xlane.xlu0 %45 }
  0xb7   :  { %v58_v9 = vmul.f32 0.03125, %v46_v8 }
  0xb8   :  { %v54_v10 = vpop.xlane.xlu1 %53 }
  0xb9   :  { %v60_v11 = vmul.f32 %v58_v9, %v46_v8  ;;  %v89_v34 = vsub.f32 %v41_v0, %v58_v9 }
  0xba   :  { %v49_v12 = vpop.xlane.xlu0 %48 }
  0xbb   :  { %v62_v13 = vsub.f32 %v54_v10, %v60_v11  ;;  %v59_v14 = vmul.f32 0.03125, %v49_v12 }
  0xbc   :  { %v57_v15 = vpop.xlane.xlu1 %56 }
  0xbd   :  { %v64_v16 = vmax.f32 %v62_v13, 0.0  ;;  %v61_v17 = vmul.f32 %v59_v14, %v49_v12  ;;  %v90_v40 = vsub.f32 %v42_v1, %v59_v14 }
  0xbf   :  { %v67_v18 = vmul.f32 0.032258064, %v64_v16  ;;  %v63_v19 = vsub.f32 %v57_v15, %v61_v17 }
  0xc1   :  { %138 = vrsqrt.f32 %v67_v18  ;;  %v65_v20 = vmax.f32 %v63_v19, 0.0  ;;  %vm71_vm1 = vcmp.eq.f32.partialorder %v67_v18, inf  ;;  %v74_v24 = vand.u32 2147483648, %v67_v18 }
  0xc2   :  { %vm73_vm2 = vcmp.eq.f32.partialorder %v67_v18, 0.0 }
  0xc3   :  { %v68_v21 = vmul.f32 0.032258064, %v65_v20 }
  0xc5   :  { %140 = vrsqrt.f32 %v68_v21  ;;  %vm78_vm3 = vcmp.eq.f32.partialorder %v68_v21, inf  ;;  %v81_v30 = vand.u32 2147483648, %v68_v21  ;;  %vm80_vm4 = vcmp.eq.f32.partialorder %v68_v21, 0.0 }
  0xcb   :  { %v139_v22 = vpop.eup %138 }
  0xcc   :  { %v70_v23 = vmul.f32 %v139_v22, %v67_v18 }
  0xce   :  { %v72_v25 = vsel %vm71_vm1, %v67_v18, %v70_v23 }
  0xcf   :  { %v75_v26 = vsel %vm73_vm2, %v74_v24, %v72_v25  ;;  %v141_v27 = vpop.eup %140 }
  0xd0   :  { %v83_v28 = vadd.f32 1e-06, %v75_v26  ;;  %v77_v29 = vmul.f32 %v141_v27, %v68_v21 }
  0xd2   :  { %142 = vrcp.f32 %v83_v28  ;;  %v79_v31 = vsel %vm78_vm3, %v68_v21, %v77_v29 }
  0xd3   :  { %v82_v32 = vsel %vm80_vm4, %v81_v30, %v79_v31 }
  0xd4   :  { %v84_v33 = vadd.f32 1e-06, %v82_v32 }
  0xd6   :  { %144 = vrcp.f32 %v84_v33 }
  0xdc   :  { %v143_v35 = vpop.eup %142 }
  0xdd   :  { %v93_v37 = vmul.f32 %v143_v35, %v89_v34 }
  0xdf   :  { %v101_v39 = vmul.f32 %v131_v36, %v93_v37 }
  0xe0   :  { %v145_v41 = vpop.eup %144 }
  0xe1   :  { %v109_v42 = vadd.f32 %v132_v38, %v101_v39  ;;  %v94_v43 = vmul.f32 %v145_v41, %v90_v40 }
  0xe3   :  { %111 = vst.msk [vmem:[#allocation7] sm:$0xff] %vm43_vm0, %v109_v42  ;;  %v102_v44 = vmul.f32 %v131_v36, %v94_v43 }
  0xe5   :  { %v110_v45 = vadd.f32 %v132_v38, %v102_v44 }
  0xe7   :  { %112 = vst.msk [vmem:[#allocation7 + $0x8] sm:$0xff] %vm43_vm0, %v110_v45 }
  0xe8   :  { %201 = shalt.err (!%p198_p6)
}
  0xe9   :  { %s202_s16 = scalar_lea.hbm %s304_s3, 256 }
  0xea   :  { %p203_p7 = scmp.ne.s32.totalorder %s304_s3, %s202_s16  ;;  %p206_p8 = scmp.lt.u32.totalorder %s202_s16, %s304_s3 }
  0xec   :  { %p208_p9 = pnand %p206_p8, %p203_p7 }
  0xee   :  { %211 = shalt.err (!%p208_p9)
}
  0xef   :  { %124 = dma.vmem_to_hbm [thread:$0]  %s119_s13, 256, %s304_s3, [#allocation4], %s220_s0, %s220_s0, %s221_s8  }
  0xf0   :  { %216 = dma.done.wait [#allocation4], 256  }
  0xf1   :  { %217 = vsyncadd [#allocation4], 4294967040 }
  0xf2   :  { %128 = vsyncpa [#allocation3], 1 }
  0xf3   :  { %129 = vsyncpa [#allocation6], 1 }
  0xf4   :  { %130 = vsyncpa [#allocation4], 1 }

</bundles_post_ra>
